<compile_context>
chip_gen: v5e
topology: v5e:2x2
jax: 0.10.0
libtpu: 0.0.40
codegen_flags: <defaults>
</compile_context>

<pallas_src>
import jax
import jax.numpy as jnp
from jax.experimental import pallas as pl
from jax.experimental.pallas import tpu as pltpu


def _leaky(x, slope=0.01):
    # identical to where(x > 0, x, slope*x) for 0 < slope < 1
    return jnp.maximum(x, slope * x)


def discriminator_kernel(x_ref,
                         w1_ref, b1_ref,
                         w2_ref, b2_ref,
                         w3h_ref, b3h_ref,
                         out_ref):
    x = x_ref[...]

    h1 = jnp.dot(x, w1_ref[...], preferred_element_type=jnp.float32) + b1_ref[...]
    h1 = _leaky(h1)
    h2 = jnp.dot(h1, w2_ref[...], preferred_element_type=jnp.float32) + b2_ref[...]
    h2 = _leaky(h2)

    # L3 and the two 1-unit heads are folded into a single (hidden2, 2) matmul.
    heads = jnp.dot(h2, w3h_ref[...], preferred_element_type=jnp.float32) + b3h_ref[...]
    out_ref[...] = _leaky(heads).astype(out_ref.dtype)


def _round_up(n, m):
    return ((n + m - 1) // m) * m


def discriminator_forward(x, params, *, tile_b=4096):
    """x: (B, input_size) float32. params: dict of pre-transposed weights/biases.
    Returns (dsc, clf) just like Discriminator.forward."""
    B, input_size = x.shape
    dsc_out = params["wd"].shape[1]
    clf_out = params["wc"].shape[1]
    heads_out = dsc_out + clf_out

    # Fuse heads laterally ([wd | wc]) and fold L3 into them (common is never
    # returned): heads = leaky( (h2 @ w3 + b3) @ wh + bh ) == leaky( h2 @ (w3@wh) + (b3@wh + bh) )
    wh = jnp.concatenate([params["wd"], params["wc"]], axis=1)   # (common_out, 2)
    bh = jnp.concatenate([params["bd"], params["bc"]], axis=1)   # (1, 2)
    w3h = params["w3"] @ wh                                      # (2*input_size, 2)
    b3h = params["b3"] @ wh + bh                                 # (1, 2)

    # --- batch tile selection -------------------------------------------------
    tb = min(tile_b, B)
    if B > 8:
        # Keep >= 2 grid steps so dimension_semantics=("parallel",) can shard
        # across both TensorCores on v7x (free on single-TC v5e/v6e).
        tb = min(tb, _round_up(pl.cdiv(B, 2), 8))
    if tb < B:
        tb = _round_up(tb, 8)        # (8, 128) sublane constraint on block rows
        if tb >= B:
            tb = B
    grid = (pl.cdiv(B, tb),)

    def row_spec(n_feat):
        return pl.BlockSpec((tb, n_feat), lambda i: (i, 0))

    def resident_spec(arr):
        # full-array block, constant index_map -> DMA'd once, stays in VMEM
        return pl.BlockSpec(arr.shape, lambda i: (0, 0))

    args = (x,
            params["w1"], params["b1"],
            params["w2"], params["b2"],
            w3h, b3h)

    in_specs = [row_spec(input_size)] + [resident_spec(a) for a in args[1:]]

    h1_dim = params["w1"].shape[1]
    h2_dim = params["w2"].shape[1]
    flops = 2 * B * (input_size * h1_dim + h1_dim * h2_dim + h2_dim * heads_out)
    weight_bytes = sum(a.size * a.dtype.itemsize for a in args[1:])
    bytes_accessed = x.size * x.dtype.itemsize + B * heads_out * 4 + weight_bytes

    out = pl.pallas_call(
        discriminator_kernel,
        out_shape=jax.ShapeDtypeStruct((B, heads_out), jnp.float32),
        grid=grid,
        in_specs=in_specs,
        out_specs=row_spec(heads_out),
        compiler_params=pltpu.CompilerParams(
            dimension_semantics=("parallel",)),
        cost_estimate=pl.CostEstimate(
            flops=flops, transcendentals=0, bytes_accessed=bytes_accessed),
    )(*args)

    dsc = out[:, :dsc_out]
    clf = out[:, dsc_out:]
    return dsc, clf


def init_params(key, input_size, dsc_output_size=1, clf_output_size=1):
    """Deterministic synthetic parameters matching the module's __init__ shapes.
    Weights are stored as (in_features, out_features) — i.e. already transposed
    relative to torch.nn.Linear.weight."""
    ks = jax.random.split(key, 10)

    def lin(kw, kb, fan_in, fan_out):
        scale = 1.0 / jnp.sqrt(jnp.float32(fan_in))
        w = jax.random.normal(kw, (fan_in, fan_out), jnp.float32) * scale
        b = jax.random.normal(kb, (1, fan_out), jnp.float32) * scale
        return w, b

    common_output_size = input_size
    w1, b1 = lin(ks[0], ks[1], input_size, input_size * 4)
    w2, b2 = lin(ks[2], ks[3], input_size * 4, input_size * 2)
    w3, b3 = lin(ks[4], ks[5], input_size * 2, common_output_size)
    wd, bd = lin(ks[6], ks[7], common_output_size, dsc_output_size)
    wc, bc = lin(ks[8], ks[9], common_output_size, clf_output_size)
    return dict(w1=w1, b1=b1, w2=w2, b2=b2, w3=w3, b3=b3,
                wd=wd, bd=bd, wc=wc, bc=bc)


def _reference_forward(x, p):
    """Pure-JAX reference for verification (matches the PyTorch module)."""
    def leaky(v): return jnp.where(v > 0, v, 0.01 * v)
    h = leaky(x @ p["w1"] + p["b1"])
    h = leaky(h @ p["w2"] + p["b2"])
    common = h @ p["w3"] + p["b3"]
    dsc = leaky(common @ p["wd"] + p["bd"])
    clf = leaky(common @ p["wc"] + p["bc"])
    return dsc, clf


if __name__ == "__main__":
    key = jax.random.PRNGKey(0)
    k_x, k_p = jax.random.split(key)

    batch = 16
    input_size = 32

    x = jax.random.normal(k_x, (batch, input_size), jnp.float32)
    params = init_params(k_p, input_size, dsc_output_size=1, clf_output_size=1)

    dsc, clf = discriminator_forward(x, params)
    jax.block_until_ready((dsc, clf))

    dsc_ref, clf_ref = _reference_forward(x, params)
    assert dsc.shape == (batch, 1) and clf.shape == (batch, 1)
    assert jnp.allclose(dsc, dsc_ref, atol=1e-5, rtol=1e-5)
    assert jnp.allclose(clf, clf_ref, atol=1e-5, rtol=1e-5)

    print("KERNEL_OK")
</pallas_src>

<mosaic_0001>
module attributes {stable_mosaic.version = 11 : i64} {
  func.func @discriminator_kernel(%arg0: i32, %arg1: memref<8x32xf32, #tpu.memory_space<vmem>>, %arg2: memref<32x128xf32, #tpu.memory_space<vmem>>, %arg3: memref<1x128xf32, #tpu.memory_space<vmem>>, %arg4: memref<128x64xf32, #tpu.memory_space<vmem>>, %arg5: memref<1x64xf32, #tpu.memory_space<vmem>>, %arg6: memref<64x2xf32, #tpu.memory_space<vmem>>, %arg7: memref<1x2xf32, #tpu.memory_space<vmem>>, %arg8: memref<8x2xf32, #tpu.memory_space<vmem>>) attributes {dimension_semantics = [#tpu.dimension_semantics<parallel>], iteration_bounds = array<i64: 2>, scalar_prefetch = 0 : i64, scratch_operands = 0 : i64, tpu.core_type = #tpu.core_type<tc>, window_params = [{transform_indices = @transform_0, window_bounds = array<i64: 8, 32>}, {pipeline_mode = #tpu.pipeline_mode<synchronous>, transform_indices = @transform_1, window_bounds = array<i64: 32, 128>}, {pipeline_mode = #tpu.pipeline_mode<synchronous>, transform_indices = @transform_2, window_bounds = array<i64: 1, 128>}, {pipeline_mode = #tpu.pipeline_mode<synchronous>, transform_indices = @transform_3, window_bounds = array<i64: 128, 64>}, {pipeline_mode = #tpu.pipeline_mode<synchronous>, transform_indices = @transform_4, window_bounds = array<i64: 1, 64>}, {pipeline_mode = #tpu.pipeline_mode<synchronous>, transform_indices = @transform_5, window_bounds = array<i64: 64, 2>}, {pipeline_mode = #tpu.pipeline_mode<synchronous>, transform_indices = @transform_6, window_bounds = array<i64: 1, 2>}, {transform_indices = @transform_7, window_bounds = array<i64: 8, 2>}]} {
    %c0 = arith.constant 0 : index
    %c0_0 = arith.constant 0 : index
    %0 = vector.load %arg1[%c0, %c0_0] : memref<8x32xf32, #tpu.memory_space<vmem>>, vector<8x32xf32>
    %c0_1 = arith.constant 0 : index
    %c0_2 = arith.constant 0 : index
    %1 = vector.load %arg2[%c0_1, %c0_2] : memref<32x128xf32, #tpu.memory_space<vmem>>, vector<32x128xf32>
    %cst = arith.constant dense<0.000000e+00> : vector<8x128xf32>
    %2 = tpu.matmul %0, %1, %cst {dimension_numbers = #tpu.dot_dimension_numbers<[1], [0], [0], [1], [0, 0, 1, 1], [], []>} : vector<8x32xf32>, vector<32x128xf32>, vector<8x128xf32> -> vector<8x128xf32>
    %c0_3 = arith.constant 0 : index
    %c0_4 = arith.constant 0 : index
    %3 = vector.load %arg3[%c0_3, %c0_4] : memref<1x128xf32, #tpu.memory_space<vmem>>, vector<1x128xf32>
    %4 = vector.broadcast %3 : vector<1x128xf32> to vector<8x128xf32>
    %5 = arith.addf %2, %4 : vector<8x128xf32>
    %cst_5 = arith.constant 0.00999999977 : f32
    %6 = vector.broadcast %cst_5 : f32 to vector<8x128xf32>
    %7 = arith.mulf %6, %5 : vector<8x128xf32>
    %8 = arith.maximumf %5, %7 : vector<8x128xf32>
    %c0_6 = arith.constant 0 : index
    %c0_7 = arith.constant 0 : index
    %9 = vector.load %arg4[%c0_6, %c0_7] : memref<128x64xf32, #tpu.memory_space<vmem>>, vector<128x64xf32>
    %cst_8 = arith.constant dense<0.000000e+00> : vector<8x64xf32>
    %10 = tpu.matmul %8, %9, %cst_8 {dimension_numbers = #tpu.dot_dimension_numbers<[1], [0], [0], [1], [0, 0, 1, 1], [], []>} : vector<8x128xf32>, vector<128x64xf32>, vector<8x64xf32> -> vector<8x64xf32>
    %c0_9 = arith.constant 0 : index
    %c0_10 = arith.constant 0 : index
    %11 = vector.load %arg5[%c0_9, %c0_10] : memref<1x64xf32, #tpu.memory_space<vmem>>, vector<1x64xf32>
    %12 = vector.broadcast %11 : vector<1x64xf32> to vector<8x64xf32>
    %13 = arith.addf %10, %12 : vector<8x64xf32>
    %cst_11 = arith.constant 0.00999999977 : f32
    %14 = vector.broadcast %cst_11 : f32 to vector<8x64xf32>
    %15 = arith.mulf %14, %13 : vector<8x64xf32>
    %16 = arith.maximumf %13, %15 : vector<8x64xf32>
    %c0_12 = arith.constant 0 : index
    %c0_13 = arith.constant 0 : index
    %17 = vector.load %arg6[%c0_12, %c0_13] : memref<64x2xf32, #tpu.memory_space<vmem>>, vector<64x2xf32>
    %cst_14 = arith.constant dense<0.000000e+00> : vector<8x2xf32>
    %18 = tpu.matmul %16, %17, %cst_14 {dimension_numbers = #tpu.dot_dimension_numbers<[1], [0], [0], [1], [0, 0, 1, 1], [], []>} : vector<8x64xf32>, vector<64x2xf32>, vector<8x2xf32> -> vector<8x2xf32>
    %c0_15 = arith.constant 0 : index
    %c0_16 = arith.constant 0 : index
    %19 = vector.load %arg7[%c0_15, %c0_16] : memref<1x2xf32, #tpu.memory_space<vmem>>, vector<1x2xf32>
    %20 = vector.broadcast %19 : vector<1x2xf32> to vector<8x2xf32>
    %21 = arith.addf %18, %20 : vector<8x2xf32>
    %cst_17 = arith.constant 0.00999999977 : f32
    %22 = vector.broadcast %cst_17 : f32 to vector<8x2xf32>
    %23 = arith.mulf %22, %21 : vector<8x2xf32>
    %24 = arith.maximumf %21, %23 : vector<8x2xf32>
    %c0_18 = arith.constant 0 : index
    %c0_19 = arith.constant 0 : index
    %25 = vector.load %arg8[%c0_18, %c0_19] : memref<8x2xf32, #tpu.memory_space<vmem>>, vector<8x2xf32>
    tpu.vector_store %arg8[%c0_18, %c0_19], %24 {strides = array<i32>} : memref<8x2xf32, #tpu.memory_space<vmem>>, vector<8x2xf32>,
    return
  }
  func.func @transform_0(%arg0: i32) -> (i32, i32) {
    %c0_i32 = arith.constant 0 : i32
    %c0_i32_0 = arith.constant 0 : i32
    return %arg0, %c0_i32 : i32, i32
  }
  func.func @transform_1(%arg0: i32) -> (i32, i32) {
    %c0_i32 = arith.constant 0 : i32
    %c0_i32_0 = arith.constant 0 : i32
    %c0_i32_1 = arith.constant 0 : i32
    return %c0_i32, %c0_i32_0 : i32, i32
  }
  func.func @transform_2(%arg0: i32) -> (i32, i32) {
    %c0_i32 = arith.constant 0 : i32
    %c0_i32_0 = arith.constant 0 : i32
    %c0_i32_1 = arith.constant 0 : i32
    return %c0_i32, %c0_i32_0 : i32, i32
  }
  func.func @transform_3(%arg0: i32) -> (i32, i32) {
    %c0_i32 = arith.constant 0 : i32
    %c0_i32_0 = arith.constant 0 : i32
    %c0_i32_1 = arith.constant 0 : i32
    return %c0_i32, %c0_i32_0 : i32, i32
  }
  func.func @transform_4(%arg0: i32) -> (i32, i32) {
    %c0_i32 = arith.constant 0 : i32
    %c0_i32_0 = arith.constant 0 : i32
    %c0_i32_1 = arith.constant 0 : i32
    return %c0_i32, %c0_i32_0 : i32, i32
  }
  func.func @transform_5(%arg0: i32) -> (i32, i32) {
    %c0_i32 = arith.constant 0 : i32
    %c0_i32_0 = arith.constant 0 : i32
    %c0_i32_1 = arith.constant 0 : i32
    return %c0_i32, %c0_i32_0 : i32, i32
  }
  func.func @transform_6(%arg0: i32) -> (i32, i32) {
    %c0_i32 = arith.constant 0 : i32
    %c0_i32_0 = arith.constant 0 : i32
    %c0_i32_1 = arith.constant 0 : i32
    return %c0_i32, %c0_i32_0 : i32, i32
  }
  func.func @transform_7(%arg0: i32) -> (i32, i32) {
    %c0_i32 = arith.constant 0 : i32
    %c0_i32_0 = arith.constant 0 : i32
    return %arg0, %c0_i32 : i32, i32
  }
}

</mosaic_0001>

<bundles_post_ra>
// kernel: tpu_custom_call.1
= control target key start
LH: loop header
LB: loop body
LE: loop exit
PB: predicated region body
PF: predicated region fallthrough
CT: control target
= control target key end

     0   :  { %s514_s24 = smov 0   ;;  %s631_s0 = inlined_call_operand.vmem [shape: f32[16,32], index: 0, kind: input, shape index: {}]   ;;  %s632_s1 = inlined_call_operand.vmem [shape: f32[32,128], index: 1, kind: input, shape index: {}]   ;;  %s633_s2 = inlined_call_operand.vmem [shape: f32[1,128], index: 2, kind: input, shape index: {}]   ;;  %s634_s3 = inlined_call_operand.vmem [shape: f32[128,64], index: 3, kind: input, shape index: {}]   ;;  %s635_s4 = inlined_call_operand.vmem [shape: f32[1,64], index: 4, kind: input, shape index: {}]   ;;  %s636_s5 = inlined_call_operand.vmem [shape: f32[64,2], index: 5, kind: input, shape index: {}]   ;;  %s637_s6 = inlined_call_operand.vmem [shape: f32[1,2], index: 6, kind: input, shape index: {}]   ;;  %s638_s7 = inlined_call_operand.vmem [shape: f32[16,2], index: 7, kind: output, shape index: {}]  }
   0x1 LB: > { %s444_s25 = sadd.s32 4294967295, %s472_s24   ;;  %p448_p0 = scmp.ge.s32.totalorder %s472_s24, 1  ;;  %s472_s24 = sphi %s514_s24, %s17_s24  }
   0x2   : > { %p236_p1 = scmp.lt.s32.totalorder %s472_s24, 3 }
   0x4   : > { %p237_p2 = pnand %p448_p0, %p236_p1 }
   0x5   : > { %p266_p3 = scmp.lt.s32.totalorder (!%p237_p2), %s444_s25, 1 }
   0x6   : > { %240 = sbr.rel (%p237_p2) target bundleno = 422 (0x1a6), region = 48 }
   0xb   : > { %v278_v0 = vld [vmem:[%s632_s1 + $0x18] sm:$0xff]  ;;  %v277_v1 = vld [vmem:[%s632_s1 + $0x10] sm:$0xff]  ;;  %v276_v4 = vld [vmem:[%s632_s1 + $0x8] sm:$0xff]  ;;  %s640_s25 = smov (!%p266_p3, %s444_s25), 1  ;;  %vm283_vm0 = vcmask 261120   ;;  %vm363_vm1 = vcmask 523264  }
   0xc   : > { %299 = vmatpush.msra.mxu0 %v278_v0  ;;  %v324_v2 = vld [vmem:[%s634_s3 + $0x78] sm:$0xff]  ;;  %v323_v3 = vld [vmem:[%s634_s3 + $0x70] sm:$0xff]  ;;  %v322_v5 = vld [vmem:[%s634_s3 + $0x68] sm:$0xff]  ;;  %s449_s17 = sshll.u32 %s640_s25, 3  ;;  %vm389_vm2 = vcmask 15360  }
   0xd   : > { %329 = vmatpush.msra.mxu1 %v324_v2  ;;  %v275_v6 = vld [vmem:[%s632_s1] sm:$0xff]  ;;  %s269_s20 = scalar_lea.vmem %s631_s0, %s449_s17  ;;  %v320_v9 = vld [vmem:[%s634_s3 + $0x58] sm:$0xff]  ;;  %v319_v10 = vld [vmem:[%s634_s3 + $0x50] sm:$0xff]  ;;  %s273_s10 = scalar_lea.vmem %s638_s7, %s449_s17 }
   0xe   : > { %300 = vmatpush.msra.mxu0 %v277_v1  ;;  %v321_v7 = vld [vmem:[%s634_s3 + $0x60] sm:$0xff]  ;;  %v318_v11 = vld [vmem:[%s634_s3 + $0x48] sm:$0xff]  ;;  %v316_v13 = vld [vmem:[%s634_s3 + $0x38] sm:$0xff] }
   0xf   : > { %330 = vmatpush.msra.mxu1 %v323_v3  ;;  %v274_v8 = vld [vmem:[%s269_s20] sm:$0xff]  ;;  %v315_v14 = vld [vmem:[%s634_s3 + $0x30] sm:$0xff]  ;;  %v314_v15 = vld [vmem:[%s634_s3 + $0x28] sm:$0xff] }
  0x10   : > { %301 = vmatpush.msra.mxu0 %v276_v4  ;;  %v317_v12 = vld [vmem:[%s634_s3 + $0x40] sm:$0xff]  ;;  %v312_v17 = vld [vmem:[%s634_s3 + $0x18] sm:$0xff]  ;;  %v311_v18 = vld [vmem:[%s634_s3 + $0x10] sm:$0xff] }
  0x11   : > { %331 = vmatpush.msra.mxu1 %v322_v5  ;;  %v313_v16 = vld [vmem:[%s634_s3 + $0x20] sm:$0xff]  ;;  %v310_v19 = vld [vmem:[%s634_s3 + $0x8] sm:$0xff]  ;;  %v358_v21 = vld [vmem:[%s636_s5 + $0x38] sm:$0xff] }
  0x12   : > { %302 = vmatpush.msra.mxu0 %v275_v6  ;;  %v309_v20 = vld [vmem:[%s634_s3] sm:$0xff]  ;;  %v357_v22 = vld [vmem:[%s636_s5 + $0x30] sm:$0xff]  ;;  %375 = vmatpush.msra.mxu2 %v358_v21  ;;  %v356_v23 = vld [vmem:[%s636_s5 + $0x28] sm:$0xff] }
  0x13   : > { %451 = vmatmul.msk.f32.vlgmr.msra.gmra.mxu0 %vm283_vm0, %v274_v8  ;;  %332 = vmatpush.msra.mxu1 %v321_v7  ;;  %v355_v24 = vld [vmem:[%s636_s5 + $0x20] sm:$0xff]  ;;  %v354_v30 = vld [vmem:[%s636_s5 + $0x18] sm:$0xff]  ;;  %v353_v31 = vld [vmem:[%s636_s5 + $0x10] sm:$0xff] }
  0x14   : > { %376 = vmatpush.msra.mxu2 %v357_v22  ;;  %v463_v25 = vld [vmem:[%s633_s2] ss:$0 sm:$0xff]  ;;  %v352_v32 = vld [vmem:[%s636_s5 + $0x8] sm:$0xff] }
  0x15   : > { %333 = vmatpush.msra.mxu1 %v320_v9  ;;  %v351_v33 = vld [vmem:[%s636_s5] sm:$0xff] }
  0x16   : > { %377 = vmatpush.msra.mxu2 %v356_v23  ;;  %v464_v34 = vld [vmem:[%s635_s4] ss:$0 sm:$0xff] }
  0x17   : > { %334 = vmatpush.msra.mxu1 %v319_v10  ;;  %v465_v39 = vld [vmem:[%s637_s6] ss:$0 sm:$0xff] }
  0x18   : > { %378 = vmatpush.msra.mxu2 %v355_v24 }
  0x19   : > { %335 = vmatpush.msra.mxu1 %v318_v11 }
  0x1a   : > { %379 = vmatpush.msra.mxu2 %v354_v30 }
  0x1b   : > { %336 = vmatpush.msra.mxu1 %v317_v12 }
  0x1c   : > { %380 = vmatpush.msra.mxu2 %v353_v31 }
  0x1d   : > { %337 = vmatpush.msra.mxu1 %v316_v13 }
  0x1e   : > { %381 = vmatpush.msra.mxu2 %v352_v32 }
  0x1f   : > { %338 = vmatpush.msra.mxu1 %v315_v14 }
  0x20   : > { %382 = vmatpush.msra.mxu2 %v351_v33 }
  0x21   : > { %339 = vmatpush.msra.mxu1 %v314_v15 }
  0x23   : > { %340 = vmatpush.msra.mxu1 %v313_v16 }
  0x25   : > { %341 = vmatpush.msra.mxu1 %v312_v17 }
  0x27   : > { %342 = vmatpush.msra.mxu1 %v311_v18 }
  0x29   : > { %343 = vmatpush.msra.mxu1 %v310_v19 }
  0x2b   : > { %344 = vmatpush.msra.mxu1 %v309_v20 }
  0x90   : > { %v304_v26 = vpop.f32.mrf.mxu0 }
  0x91   : > { %v305_v27 = vadd.f32 %v463_v25, %v304_v26 }
  0x93   : > { %v307_v28 = vmul.f32 0.01, %v305_v27 }
  0x95   : > { %v308_v29 = vmax.f32 %v305_v27, %v307_v28 }
  0x97   : > { %345 = vmatmul.f32.vlgmr.msra.gmra.mxu1 %v308_v29 }
 0x114   : > { %v346_v35 = vpop.f32.mrf.mxu1 }
 0x115   : > { %v347_v36 = vadd.f32 %v464_v34, %v346_v35 }
 0x117   : > { %v349_v37 = vmul.f32 0.01, %v347_v36 }
 0x119   : > { %v350_v38 = vmax.f32 %v347_v36, %v349_v37 }
 0x11b   : > { %452 = vmatmul.msk.f32.vlgmr.msra.gmra.mxu2 %vm363_vm1, %v350_v38 }
 0x19e   : > { %v384_v40 = vpop.f32.mrf.mxu2 }
 0x19f   : > { %v385_v41 = vadd.f32 %v465_v39, %v384_v40 }
 0x1a1   : > { %v387_v42 = vmul.f32 0.01, %v385_v41 }
 0x1a3   : > { %v388_v43 = vmax.f32 %v385_v41, %v387_v42 }
 0x1a5   : > { %390 = vst.msk [vmem:[%s273_s10] sm:$0xff] %vm389_vm2, %v388_v43 }
 0x1a6 PF: > { %s17_s24 = sadd.s32 1, %s472_s24  }
 0x1a7   : > { %p14_p4 = scmp.ge.s32.totalorder %s17_s24, 4  }
 0x1a9   :  { %16 = sbr.rel (!%p14_p4) target bundleno = 1 (0x1), region = 78 }

</bundles_post_ra>
